<compile_context>
chip_gen: v5e
topology: v5e:2x2
jax: 0.10.0
libtpu: 0.0.40
codegen_flags: <defaults>
</compile_context>

<pallas_src>
import jax
import jax.numpy as jnp
from jax.experimental import pallas as pl
from jax.experimental.pallas import tpu as pltpu

TAU = 2.0          # LIFNode default tau
V_TH = 1.0         # LIFNode default v_threshold
BN_EPS = 1e-5      # BatchNorm3d default eps
_LIF_THRESH = TAU * V_TH   # bn/tau >= v_th  <=>  bn >= tau*v_th  (tau > 0)


def _cdiv(a, b):
    return -(-a // b)


def _round_up(v, m):
    return ((v + m - 1) // m) * m


def _proj_stats_kernel(p_ref, w_ref, sum_ref, ssq_ref):
    """Pass 1: bf16 matmul (f32 accum) + per-channel sum / sum-of-squares.

    Grid = (2, n_half): axis 0 is the TensorCore split ("parallel"), axis 1
    walks that half's patch tiles ("arbitrary" -> resident accumulator).
    Partial sums are kept as (8, E_f) sublane accumulators: per step this is
    only elementwise vreg adds (no cross-sublane XLU reduce); the 8 sublanes
    are collapsed in the wrapper.  y is never written to HBM.
    """
    step = pl.program_id(1)
    y = jnp.dot(p_ref[...], w_ref[...], preferred_element_type=jnp.float32)

    @pl.when(step == 0)
    def _init():
        sum_ref[...] = jnp.zeros_like(sum_ref)
        ssq_ref[...] = jnp.zeros_like(ssq_ref)

    rows, cols = y.shape
    yr = y.reshape(rows // 8, 8, cols)            # vreg-aligned row groups
    sum_ref[...] += jnp.sum(yr, axis=0).reshape(1, 8, cols)
    ssq_ref[...] += jnp.sum(yr * yr, axis=0).reshape(1, 8, cols)


def _proj_bn_lif_kernel(p_ref, w_ref, scale_ref, shift_ref, o_ref):
    """Pass 2: recompute matmul, fused BN affine + LIF threshold, bf16 spikes."""
    y = jnp.dot(p_ref[...], w_ref[...], preferred_element_type=jnp.float32)
    bn = y * scale_ref[...] + shift_ref[...]
    o_ref[...] = (bn >= _LIF_THRESH).astype(o_ref.dtype)


def _vmem_limit_bytes(tile_rows, k_f, e_f):
    """Explicit VMEM ceiling from the actual tile footprint (+50% headroom).

    Kept <= 48 MiB so it always fits v7x's 64 MiB physical VMEM; >= 32 MiB so
    small problems keep the default scoped budget on v5e/v6e.
    """
    io = 2 * tile_rows * (k_f + e_f) * 2          # double-buffered bf16 in/out blocks
    wgt = 2 * k_f * e_f * 2                       # (constant-index) weight, 2 buffers
    tmp = 2 * tile_rows * e_f * 4                 # f32 matmul result + fused temporaries
    est = io + wgt + tmp
    return int(min(max(3 * est // 2, 32 << 20), 48 << 20))


def spiking_patch_embed_3d(x, weight, bias, gamma, beta,
                           patch_size=(2, 2, 2), target_rows=8192,
                           channels_last=False, out_dtype=jnp.float32):
    # NOTE: `bias` is accepted for API parity but intentionally unused: the conv
    # bias is a per-channel constant that BatchNorm's mean subtraction cancels
    # exactly, so it never influences the output.
    del bias
    N, C, D, H, W = x.shape
    pd, ph, pw = patch_size
    E = weight.shape[0]
    Do, Ho, Wo = D // pd, H // ph, W // pw
    K = C * pd * ph * pw
    P = N * Do * Ho * Wo

    # ---- lane-densification factor: fold r patches per row so last dims hit 128 ----
    r = 128 // E if (E < 128 and 128 % E == 0) else 1
    K_f, E_f = r * K, r * E

    # ---- glue: im2col (non-overlapping, stride == kernel -> exact) in bf16 ----
    xp = x.astype(jnp.bfloat16).reshape(N, C, Do, pd, Ho, ph, Wo, pw)
    xp = xp.transpose(0, 2, 4, 6, 1, 3, 5, 7).reshape(P, K)

    # ---- tile selection: ~2 MiB bf16 input blocks, minimal padding ----
    P_flat = _cdiv(P, r)
    rows_by_bytes = max(8, (2 << 20) // (K_f * 2))          # ~2 MiB input block
    target = max(8, min(int(target_rows), rows_by_bytes))
    n_blocks = max(2, 2 * _cdiv(_cdiv(P_flat, target), 2))  # even, >= 2 (TC split)
    tile_f = max(8, _round_up(_cdiv(P_flat, n_blocks), 8))
    P_flat_pad = n_blocks * tile_f                          # waste <= n_blocks*8 rows
    n_half = n_blocks // 2

    rows_pad = P_flat_pad * r - P
    if rows_pad:
        # zero rows (no bias in compute) contribute exactly 0 to sum and sum-sq
        xp = jnp.pad(xp, ((0, rows_pad), (0, 0)))
    xpf = xp.reshape(P_flat_pad, K_f)

    # block-diagonal weight: [K_f, E_f] = kron(I_r, W[K, E]), bf16 for the MXU
    w2 = weight.reshape(E, K).T
    wb = jnp.kron(jnp.eye(r, dtype=w2.dtype), w2).astype(jnp.bfloat16)

    vmem_limit = _vmem_limit_bytes(tile_f, K_f, E_f)

    def _mosaic(sem):
        return pltpu.CompilerParams(dimension_semantics=sem,
                                    vmem_limit_bytes=vmem_limit)

    # ---- pass 1: stats only (per-channel sum / sum-of-squares, split over 2 TCs) ----
    sums, ssqs = pl.pallas_call(
        _proj_stats_kernel,
        grid_spec=pltpu.PrefetchScalarGridSpec(
            num_scalar_prefetch=0, grid=(2, n_half),
            in_specs=[pl.BlockSpec((tile_f, K_f), lambda c, i: (c * n_half + i, 0)),
                      pl.BlockSpec((K_f, E_f), lambda c, i: (0, 0))],
            out_specs=[pl.BlockSpec((1, 8, E_f), lambda c, i: (c, 0, 0)),
                       pl.BlockSpec((1, 8, E_f), lambda c, i: (c, 0, 0))]),
        out_shape=(jax.ShapeDtypeStruct((2, 8, E_f), jnp.float32),
                   jax.ShapeDtypeStruct((2, 8, E_f), jnp.float32)),
        compiler_params=_mosaic(("parallel", "arbitrary")),
    )(xpf, wb)

    # ---- glue: combine partial sums, fold BN into per-channel scale/shift ----
    s = sums.reshape(-1, E).sum(axis=0)
    ss = ssqs.reshape(-1, E).sum(axis=0)
    mean = s / P
    var = jnp.maximum(ss / P - mean * mean, 0.0)    # biased (train-mode) BN variance,
    inv_std = jax.lax.rsqrt(var + BN_EPS)           # clamped against f32 cancellation
    scale = gamma * inv_std
    shift = beta - mean * scale
    scale_f = jnp.tile(scale, r).reshape(1, E_f).astype(jnp.float32)
    shift_f = jnp.tile(shift, r).reshape(1, E_f).astype(jnp.float32)

    # ---- pass 2: matmul + fused BN affine + LIF spike, lane-dense bf16 output ----
    spikes = pl.pallas_call(
        _proj_bn_lif_kernel,
        grid_spec=pltpu.PrefetchScalarGridSpec(
            num_scalar_prefetch=0, grid=(2, n_half),
            in_specs=[pl.BlockSpec((tile_f, K_f), lambda c, i: (c * n_half + i, 0)),
                      pl.BlockSpec((K_f, E_f), lambda c, i: (0, 0)),
                      pl.BlockSpec((1, E_f), lambda c, i: (0, 0)),
                      pl.BlockSpec((1, E_f), lambda c, i: (0, 0))],
            out_specs=pl.BlockSpec((tile_f, E_f), lambda c, i: (c * n_half + i, 0))),
        out_shape=jax.ShapeDtypeStruct((P_flat_pad, E_f), jnp.bfloat16),
        compiler_params=_mosaic(("parallel", "parallel")),
    )(xpf, wb, scale_f, shift_f)

    # ---- glue: un-flatten, drop padding ----
    out_cl = spikes.reshape(P_flat_pad * r, E)[:P].reshape(N, Do, Ho, Wo, E)
    if channels_last:
        # Fast path: kernels' native tokens-major / channels-last layout, no extra
        # HBM relayout pass (spikes are exactly 0/1 so any dtype is lossless).
        return out_cl.astype(out_dtype)
    # PyTorch-parity NCDHW layout (costs one extra HBM relayout + upcast).
    return out_cl.astype(out_dtype).transpose(0, 4, 1, 2, 3)


def _reference(x, weight, bias, gamma, beta, patch_size):
    """Pure-JAX reference using the same bf16 operand quantization (f32 accum)."""
    y = jax.lax.conv_general_dilated(
        x.astype(jnp.bfloat16), weight.astype(jnp.bfloat16),
        window_strides=patch_size, padding="VALID",
        dimension_numbers=("NCDHW", "OIDHW", "NCDHW"),
        preferred_element_type=jnp.float32)
    y = y + bias.reshape(1, -1, 1, 1, 1)
    mean = y.mean(axis=(0, 2, 3, 4), keepdims=True)
    var = ((y - mean) ** 2).mean(axis=(0, 2, 3, 4), keepdims=True)
    bn = (y - mean) * jax.lax.rsqrt(var + BN_EPS)
    bn = bn * gamma.reshape(1, -1, 1, 1, 1) + beta.reshape(1, -1, 1, 1, 1)
    spikes = (bn >= _LIF_THRESH).astype(jnp.float32)
    return bn, spikes


if __name__ == "__main__":
    # small shapes consistent with the module
    N, C_in, D, H, W = 2, 4, 8, 8, 8
    embed_dim = 32
    patch_size = (2, 2, 2)

    key = jax.random.PRNGKey(0)
    k1, k2, k3, k4, k5 = jax.random.split(key, 5)
    weight = 0.2 * jax.random.normal(k1, (embed_dim, C_in, *patch_size), jnp.float32)
    bias = 0.1 * jax.random.normal(k2, (embed_dim,), jnp.float32)
    gamma = 1.0 + 0.1 * jax.random.normal(k3, (embed_dim,), jnp.float32)
    beta = 0.1 * jax.random.normal(k4, (embed_dim,), jnp.float32)
    x = jax.random.normal(k5, (N, C_in, D, H, W), jnp.float32)

    out = spiking_patch_embed_3d(x, weight, bias, gamma, beta, patch_size)
    out = jax.block_until_ready(out)

    assert out.shape == (N, embed_dim, D // 2, H // 2, W // 2), out.shape
    assert bool(jnp.all((out == 0.0) | (out == 1.0)))

    bn_ref, spk_ref = _reference(x, weight, bias, gamma, beta, patch_size)
    # Hard-threshold output: demand exact agreement everywhere except for pre-spike
    # activations sitting inside a tiny band around the threshold, where reduction
    # order / bf16 rounding may legitimately flip the Heaviside.
    near_threshold = jnp.abs(bn_ref - _LIF_THRESH) < 5e-3
    agree = (out == spk_ref) | near_threshold
    assert bool(jnp.all(agree)), "mismatch vs pure-JAX reference away from threshold"

    # channels-last fast path (no output relayout) must match the NCDHW result
    out_cl = spiking_patch_embed_3d(x, weight, bias, gamma, beta, patch_size,
                                    channels_last=True, out_dtype=jnp.bfloat16)
    out_cl = jax.block_until_ready(out_cl)
    assert bool(jnp.all(out_cl.astype(jnp.float32).transpose(0, 4, 1, 2, 3) == out))

    print("KERNEL_OK")
</pallas_src>

<mosaic_0001>
module attributes {stable_mosaic.version = 11 : i64} {
  func.func @_proj_stats_kernel(%arg0: i32, %arg1: i32, %arg2: memref<16x128xbf16, #tpu.memory_space<vmem>>, %arg3: memref<128x128xbf16, #tpu.memory_space<vmem>>, %arg4: memref<1x8x128xf32, #tpu.memory_space<vmem>>, %arg5: memref<1x8x128xf32, #tpu.memory_space<vmem>>) attributes {dimension_semantics = [#tpu.dimension_semantics<parallel>, #tpu.dimension_semantics<arbitrary>], iteration_bounds = array<i64: 2, 1>, scalar_prefetch = 0 : i64, scratch_operands = 0 : i64, tpu.core_type = #tpu.core_type<tc>, window_params = [{transform_indices = @transform_0, window_bounds = array<i64: 16, 128>}, {pipeline_mode = #tpu.pipeline_mode<synchronous>, transform_indices = @transform_1, window_bounds = array<i64: 128, 128>}, {transform_indices = @transform_2, window_bounds = array<i64: 1, 8, 128>}, {transform_indices = @transform_3, window_bounds = array<i64: 1, 8, 128>}]} {
    %c0 = arith.constant 0 : index
    %c0_0 = arith.constant 0 : index
    %0 = vector.load %arg2[%c0, %c0_0] : memref<16x128xbf16, #tpu.memory_space<vmem>>, vector<16x128xbf16>
    %c0_1 = arith.constant 0 : index
    %c0_2 = arith.constant 0 : index
    %1 = vector.load %arg3[%c0_1, %c0_2] : memref<128x128xbf16, #tpu.memory_space<vmem>>, vector<128x128xbf16>
    %cst = arith.constant dense<0.000000e+00> : vector<16x128xf32>
    %2 = tpu.matmul %0, %1, %cst {dimension_numbers = #tpu.dot_dimension_numbers<[1], [0], [0], [1], [0, 0, 1, 1], [], []>} : vector<16x128xbf16>, vector<128x128xbf16>, vector<16x128xf32> -> vector<16x128xf32>
    %c0_i32 = arith.constant 0 : i32
    %3 = arith.cmpi eq, %arg1, %c0_i32 : i32
    %4 = arith.extui %3 : i1 to i32
    %c0_i32_3 = arith.constant 0 : i32
    %5 = arith.cmpi ne, %4, %c0_i32_3 : i32
    scf.if %5 {
      %cst_18 = arith.constant 0.000000e+00 : f32
      %18 = vector.broadcast %cst_18 : f32 to vector<1x8x128xf32>
      %c0_19 = arith.constant 0 : index
      %c0_20 = arith.constant 0 : index
      %c0_21 = arith.constant 0 : index
      %19 = vector.load %arg4[%c0_19, %c0_20, %c0_21] : memref<1x8x128xf32, #tpu.memory_space<vmem>>, vector<1x8x128xf32>
      tpu.vector_store %arg4[%c0_19, %c0_20, %c0_21], %18 {strides = array<i32>} : memref<1x8x128xf32, #tpu.memory_space<vmem>>, vector<1x8x128xf32>,
      %cst_22 = arith.constant 0.000000e+00 : f32
      %20 = vector.broadcast %cst_22 : f32 to vector<1x8x128xf32>
      %c0_23 = arith.constant 0 : index
      %c0_24 = arith.constant 0 : index
      %c0_25 = arith.constant 0 : index
      %21 = vector.load %arg5[%c0_23, %c0_24, %c0_25] : memref<1x8x128xf32, #tpu.memory_space<vmem>>, vector<1x8x128xf32>
      tpu.vector_store %arg5[%c0_23, %c0_24, %c0_25], %20 {strides = array<i32>} : memref<1x8x128xf32, #tpu.memory_space<vmem>>, vector<1x8x128xf32>,
    } else {
    }
    %6 = vector.shape_cast %2 : vector<16x128xf32> to vector<2x8x128xf32>
    %c0_4 = arith.constant 0 : index
    %c0_5 = arith.constant 0 : index
    %c0_6 = arith.constant 0 : index
    %7 = vector.load %arg4[%c0_4, %c0_5, %c0_6] : memref<1x8x128xf32, #tpu.memory_space<vmem>>, vector<1x8x128xf32>
    %cst_7 = arith.constant dense<0.000000e+00> : vector<8x128xf32>
    %8 = vector.multi_reduction <add>, %6, %cst_7 [0] : vector<2x8x128xf32> to vector<8x128xf32>
    %9 = vector.shape_cast %8 : vector<8x128xf32> to vector<1x8x128xf32>
    %10 = arith.addf %7, %9 : vector<1x8x128xf32>
    %c0_8 = arith.constant 0 : index
    %c0_9 = arith.constant 0 : index
    %c0_10 = arith.constant 0 : index
    %11 = vector.load %arg4[%c0_8, %c0_9, %c0_10] : memref<1x8x128xf32, #tpu.memory_space<vmem>>, vector<1x8x128xf32>
    tpu.vector_store %arg4[%c0_8, %c0_9, %c0_10], %10 {strides = array<i32>} : memref<1x8x128xf32, #tpu.memory_space<vmem>>, vector<1x8x128xf32>,
    %c0_11 = arith.constant 0 : index
    %c0_12 = arith.constant 0 : index
    %c0_13 = arith.constant 0 : index
    %12 = vector.load %arg5[%c0_11, %c0_12, %c0_13] : memref<1x8x128xf32, #tpu.memory_space<vmem>>, vector<1x8x128xf32>
    %13 = arith.mulf %6, %6 : vector<2x8x128xf32>
    %cst_14 = arith.constant dense<0.000000e+00> : vector<8x128xf32>
    %14 = vector.multi_reduction <add>, %13, %cst_14 [0] : vector<2x8x128xf32> to vector<8x128xf32>
    %15 = vector.shape_cast %14 : vector<8x128xf32> to vector<1x8x128xf32>
    %16 = arith.addf %12, %15 : vector<1x8x128xf32>
    %c0_15 = arith.constant 0 : index
    %c0_16 = arith.constant 0 : index
    %c0_17 = arith.constant 0 : index
    %17 = vector.load %arg5[%c0_15, %c0_16, %c0_17] : memref<1x8x128xf32, #tpu.memory_space<vmem>>, vector<1x8x128xf32>
    tpu.vector_store %arg5[%c0_15, %c0_16, %c0_17], %16 {strides = array<i32>} : memref<1x8x128xf32, #tpu.memory_space<vmem>>, vector<1x8x128xf32>,
    return
  }
  func.func @transform_0(%arg0: i32, %arg1: i32) -> (i32, i32) {
    %c1_i32 = arith.constant 1 : i32
    %0 = arith.muli %arg0, %c1_i32 : i32
    %1 = arith.addi %0, %arg1 : i32
    %c0_i32 = arith.constant 0 : i32
    %c0_i32_0 = arith.constant 0 : i32
    return %1, %c0_i32 : i32, i32
  }
  func.func @transform_1(%arg0: i32, %arg1: i32) -> (i32, i32) {
    %c0_i32 = arith.constant 0 : i32
    %c0_i32_0 = arith.constant 0 : i32
    %c0_i32_1 = arith.constant 0 : i32
    return %c0_i32, %c0_i32_0 : i32, i32
  }
  func.func @transform_2(%arg0: i32, %arg1: i32) -> (i32, i32, i32) {
    %c0_i32 = arith.constant 0 : i32
    %c0_i32_0 = arith.constant 0 : i32
    %c0_i32_1 = arith.constant 0 : i32
    return %arg0, %c0_i32, %c0_i32_0 : i32, i32, i32
  }
  func.func @transform_3(%arg0: i32, %arg1: i32) -> (i32, i32, i32) {
    %c0_i32 = arith.constant 0 : i32
    %c0_i32_0 = arith.constant 0 : i32
    %c0_i32_1 = arith.constant 0 : i32
    return %arg0, %c0_i32, %c0_i32_0 : i32, i32, i32
  }
}

</mosaic_0001>

<bundles_post_ra>
// kernel: tpu_custom_call.1
= control target key start
LH: loop header
LB: loop body
LE: loop exit
PB: predicated region body
PF: predicated region fallthrough
CT: control target
= control target key end

     0   :  { %s1030_s0 = inlined_call_operand.hbm [shape: bf16[32,128], index: 0, kind: input, shape index: {}]   ;;  %s1031_s1 = inlined_call_operand.hbm [shape: bf16[128,128], index: 1, kind: input, shape index: {}]   ;;  %s1032_s2 = inlined_call_operand.hbm [shape: f32[2,8,128], index: 2, kind: output, shape index: {0}]   ;;  %s1033_s3 = inlined_call_operand.hbm [shape: f32[2,8,128], index: 3, kind: output, shape index: {1}]  }
   0x1   :  { %1035 = sst [smem:[#allocation14_spill]] %s1031_s1 }
   0x2   :  { %9 = vsyncpa [#allocation3], 0 }
   0x3   :  { %11 = vsyncpa [#allocation3 + $0x1], 0 }
   0x4   :  { %12 = vsyncpa [#allocation6], 0 }
   0x5   :  { %13 = vsyncpa [#allocation4], 0 }
   0x6   :  { %15 = vsyncpa [#allocation4 + $0x1], 0 }
   0x7   :  { %16 = vsyncpa [#allocation9], 0 }
   0x8   :  { %18 = vsyncpa [#allocation9 + $0x1], 0  ;;  %s844_s12 = smov 0   ;;  %s846_s13 = smov 0  }
   0x9   :  { %s848_s14 = smov 0   ;;  %s850_s15 = smov 0  }
   0xa   :  { %s852_s16 = smov 0   ;;  %s854_s17 = smov 0  }
   0xb LB: > { %s495_s18 = sadd.s32 4294967295, %s819_s17   ;;  %s496_s19 = sadd.s32 4294967294, %s819_s17   ;;  %s819_s17 = sphi %s854_s17, %s24_s17   ;;  %s815_s16 = sphi %s852_s16, %s1049_s16   ;;  %s811_s15 = sphi %s850_s15, %s1048_s15   ;;  %s807_s14 = sphi %s848_s14, %s1047_s14   ;;  %s803_s13 = sphi %s846_s13, %s1046_s13   ;;  %s799_s12 = sphi %s844_s12, %s1045_s12  }
   0xc   : > { %p58_p0 = scmp.ne.s32.totalorder %s803_s13, %s799_s12  ;;  %p878_p1 = scmp.eq.s32.totalorder %s495_s18, 0 }
   0xd   : > { %p882_p2 = scmp.eq.s32.totalorder %s495_s18, 1  ;;  %p109_p3 = scmp.eq.s32.totalorder %s496_s19, 1 }
   0xe   : > { %p888_p4 = por %p878_p1, %p58_p0  ;;  %p497_p5 = scmp.ge.s32.totalorder %s819_s17, 1 }
   0xf   : > { %p893_p6 = por %p109_p3, %p58_p0  ;;  %p142_p7 = scmp.lt.s32.totalorder %s819_s17, 3 }
  0x10   : > { %s1040_s1 = sld [smem:[#allocation14_spill]]  ;;  %s821_s28 = smov [#allocation5]  }
  0x11   : > { %p901_p8 = pnand %p497_p5, %p142_p7  ;;  %s155_s29 = sshll.u32 %s821_s28, 4  ;;  %s156_s29 = int_to_ptr.vmem [resolvable:$true] %s155_s29 }
  0x12   : > { %p499_p11 = scmp.ge.s32.totalorder %s819_s17, 2  ;;  %s1034_s30 = smov 64  }
  0x13   : > { %p570_p9 = pneg %p901_p8  ;;  %s823_s4 = smov 4  }
  0x14   : > { %s36_s5 = sadd.s32 1, %s815_s16  ;;  %s45_s6 = sadd.s32 1, %s807_s14 }
  0x15   : > { %p571_p10 = pnand %p570_p9, %p878_p1  ;;  %p38_p12 = scmp.ge.s32.totalorder %s36_s5, 2 }
  0x16   : > { %s153_s26 = sshll.u32 %s1040_s1, 4  ;;  %p52_p13 = scmp.ne.s32.totalorder %s807_s14, %s803_s13  ;;  %s154_s26 = int_to_ptr.hbm [resolvable:$true] %s153_s26 }
  0x17   : > { %573 = dma.hbm_to_vmem [thread:$0]  (!%p571_p10), %s154_s26, 1024, %s156_s29, [#allocation6], %s1034_s30, %s1034_s30, %s823_s4  }
  0x18   : > { %p53_p0 = scmp.eq.s32.totalorder %s819_s17, 0  ;;  %s1051_s5 = smov (%p38_p12, %s36_s5), 0 }
  0x19   : > { %p926_p5 = por %p882_p2, %p52_p13  ;;  %s42_s9 = ssub.s32 %s815_s16, %s1051_s5 }
  0x1a   : > { %p920_p3 = por %p53_p0, %p52_p13  ;;  %p586_p7 = scmp.lt.s32.totalorder %s819_s17, 2 }
  0x1b   : > { %p43_p9 = scmp.eq.s32.totalorder %s42_s9, 0  ;;  %s169_s10 = sand.u32 1, %s807_s14  }
  0x1c   : > { %s500_s11 = sshll.u32 %s169_s10, 3  ;;  %s550_s19 = sshll.u32 %s815_s16, 3 }
  0x1d   : > { %s935_s18 = scalar_select %p43_p9, %s807_s14, %s45_s6  }
  0x1e   : > { %s179_s26 = scalar_lea.hbm %s1030_s0, %s550_s19  ;;  %s173_s28 = scalar_lea.vmem [#allocation2], %s500_s11 }
  0x1f   : > { %s182_s29 = sshll.u32 %s173_s28, 4  ;;  %s180_s21 = sshll.u32 %s179_s26, 4  ;;  %s183_s29 = int_to_ptr.vmem [resolvable:$true] %s182_s29  ;;  %s181_s21 = int_to_ptr.hbm [resolvable:$true] %s180_s21 }
  0x20   : > { %p575_p2 = pnand %p586_p7, %p920_p3  ;;  %s170_s30 = scalar_lea.sflag [#allocation3], %s169_s10 }
  0x21   : > { %s1044_s1 = smov 64   ;;  %194 = sbr.rel (%p901_p8) target bundleno = 224 (0xe0), region = 28 }
  0x22   : > { %577 = dma.hbm_to_vmem [thread:$0]  (!%p575_p2), %s181_s21, 128, %s183_s29, %s170_s30, %s1044_s1, %s1044_s1, %s823_s4  }
  0x23   : > { %s949_s6 = sand.u32 (!%p901_p8), 1, %s803_s13  }
  0x24   : > { %s952_s9 = sshll.u32 (!%p901_p8), %s949_s6, 3  ;;  %s197_s11 = scalar_lea.sflag (!%p901_p8), [#allocation3], %s949_s6 }
  0x25   : > { %s200_s7 = scalar_lea.vmem (!%p901_p8), [#allocation2], %s952_s9 }
  0x26   : > { %782 = dma.done.wait (%p888_p4), %s197_s11, 128  }
  0x27   : > { %784 = vsyncadd (%p888_p4), %s197_s11, 4294967168 }
  0x28   : > { %786 = dma.done.wait (%p878_p1), [#allocation6], 1024  }
  0x29   : > { %788 = vsyncadd (%p878_p1), [#allocation6], 4294966272  ;;  %v559_v0 = vld [vmem:[#allocation5 + $0x38] sm:$0xff]  ;;  %v558_v1 = vld [vmem:[#allocation5 + $0x30] sm:$0xff]  ;;  %s546_s1 = sshll.u32 %s811_s15, 3  ;;  %s226_s19 = scalar_lea.vmem [#allocation7], %s952_s9 }
  0x2a   : > { %308 = vmatpush.bf16.msra.mxu0 %v559_v0  ;;  %v557_v2 = vld [vmem:[#allocation5 + $0x28] sm:$0xff]  ;;  %v556_v3 = vld [vmem:[#allocation5 + $0x20] sm:$0xff]  ;;  %v555_v4 = vld [vmem:[#allocation5 + $0x18] sm:$0xff]  ;;  %s354_s27 = scalar_lea.hbm %s1032_s2, %s546_s1  ;;  %s368_s10 = scalar_lea.hbm %s1033_s3, %s546_s1 }
  0x2b   : > { %v554_v5 = vld [vmem:[#allocation5 + $0x10] sm:$0xff]  ;;  %v553_v6 = vld [vmem:[#allocation5 + $0x8] sm:$0xff]  ;;  %v552_v7 = vld [vmem:[#allocation5] sm:$0xff]  ;;  %s972_s24 = sshll.u32 %s226_s19, 4  ;;  %s358_s25 = sshll.u32 %s354_s27, 4  ;;  %s357_s24 = int_to_ptr.vmem [resolvable:$true] %s972_s24  ;;  %s359_s25 = int_to_ptr.hbm [resolvable:$true] %s358_s25 }
  0x2c   : > { %v551_v8 = vld [vmem:[%s200_s7] sm:$0xff]  ;;  %s233_s15 = scalar_lea.vmem [#allocation8], %s952_s9  ;;  %s372_s28 = sshll.u32 %s368_s10, 4  ;;  %s979_s28 = int_to_ptr.hbm [resolvable:$true] %s372_s28 }
  0x2d   : > { %s975_s26 = sshll.u32 %s233_s15, 4  ;;  %s339_s29 = scalar_lea.sflag [#allocation4], %s949_s6  ;;  %s371_s26 = int_to_ptr.vmem [resolvable:$true] %s975_s26 }
  0x2e   : > { %309 = vmatpush.bf16.msra.mxu0 %v558_v1  ;;  %s715_s21 = sshra.s32 %s359_s25, 4  ;;  %s721_s1 = scalar_lea.hbm %s1032_s2, 16  ;;  %s716_s21 = int_to_ptr.hbm [resolvable:$true] %s715_s21 }
  0x2f   : > { %s717_s11 = scalar_lea.hbm %s716_s21, 8  ;;  %p722_p10 = scmp.lt.s32.totalorder %s716_s21, %s1032_s2 }
  0x30   : > { %p718_p1 = scmp.ne.s32.totalorder %s716_s21, %s717_s11  ;;  %p723_p12 = scmp.lt.s32.totalorder %s721_s1, %s717_s11 }
  0x32   : > { %310 = vmatpush.bf16.msra.mxu0 %v557_v2  ;;  %p719_p4 = pnand %p718_p1, %p926_p5  ;;  %p724_p13 = por %p723_p12, %p722_p10 }
  0x34   : > { %p720_p8 = pneg %p719_p4 }
  0x36   : > { %311 = vmatpush.bf16.msra.mxu0 %v556_v3  ;;  %p725_p0 = pnand %p724_p13, %p720_p8 }
  0x3a   : > { %312 = vmatpush.bf16.msra.mxu0 %v555_v4 }
  0x3e   : > { %313 = vmatpush.bf16.msra.mxu0 %v554_v5 }
  0x42   : > { %314 = vmatpush.bf16.msra.mxu0 %v553_v6 }
  0x46   : > { %315 = vmatpush.bf16.msra.mxu0 %v552_v7 }
  0x49   : > { %316 = vmatmul.bf16.vlgmr.msra.gmra.mxu0 %v551_v8 }
  0xc6   : > { %v317_v9 = vpop.f32.mrf.mxu0 }
  0xc7   : > { %v333_v11 = vmul.f32 %v317_v9, %v317_v9 }
  0xce   : > { %v319_v10 = vpop.f32.mrf.mxu0 }
  0xcf   : > { %v329_v12 = vadd.f32 %v319_v10, %v317_v9  ;;  %v334_v13 = vmul.f32 %v319_v10, %v319_v10 }
  0xd1   : > { %v335_v14 = vadd.f32 %v334_v13, %v333_v11  ;;  %331 = vst [vmem:[%s226_s19] sm:$0xff] %v329_v12 }
  0xd2   : > { %728 = shalt.err (!%p725_p0)
}
  0xd3   : > { %566 = dma.vmem_to_hbm [thread:$0]  (%p926_p5), %s357_s24, 128, %s359_s25, %s339_s29   ;;  %337 = vst [vmem:[%s233_s15] sm:$0xff] %v335_v14 }
  0xd4   : > { %s344_s27 = scalar_lea.sflag [#allocation9], %s949_s6  ;;  %s743_s30 = sshra.s32 %s979_s28, 4  ;;  %s744_s30 = int_to_ptr.hbm [resolvable:$true] %s743_s30 }
  0xd5   : > { %s745_s4 = scalar_lea.hbm %s744_s30, 8  ;;  %s749_s21 = scalar_lea.hbm %s1033_s3, 16 }
  0xd6   : > { %p746_p3 = scmp.ne.s32.totalorder %s744_s30, %s745_s4  ;;  %p750_p2 = scmp.lt.s32.totalorder %s744_s30, %s1033_s3 }
  0xd7   : > { %p751_p1 = scmp.lt.s32.totalorder %s749_s21, %s745_s4 }
  0xd8   : > { %p747_p7 = pnand %p746_p3, %p926_p5 }
  0xd9   : > { %p752_p4 = por %p751_p1, %p750_p2 }
  0xda   : > { %p748_p9 = pneg %p747_p7 }
  0xdc   : > { %p753_p8 = pnand %p752_p4, %p748_p9 }
  0xde   : > { %756 = shalt.err (!%p753_p8)
}
  0xdf   : > { %567 = dma.vmem_to_hbm [thread:$0]  (%p926_p5), %s371_s26, 128, %s979_s28, %s344_s27  }
  0xe0 PF: > { %s384_s6 = sand.u32 1, %s799_s12   ;;  %p579_p10 = pnand %p499_p11, %p893_p6 }
  0xe1   : > { %s385_s24 = scalar_lea.sflag [#allocation4], %s384_s6 }
  0xe2   : > { %p580_p12 = pneg %p579_p10 }
  0xe4   : > { %790 = dma.done.wait (%p580_p12), %s385_s24, 128  }
  0xe5   : > { %792 = vsyncadd (%p580_p12), %s385_s24, 4294967168  ;;  %s395_s25 = scalar_lea.sflag [#allocation9], %s384_s6 }
  0xe6   : > { %794 = dma.done.wait (%p580_p12), %s395_s25, 128  }
  0xe7   : > { %796 = vsyncadd (%p580_p12), %s395_s25, 4294967168  ;;  %s24_s17 = sadd.s32 1, %s819_s17   ;;  %s1045_s12 = smov %s803_s13 }
  0xe8   : > { %p21_p13 = scmp.ge.s32.totalorder %s24_s17, 4   ;;  %s1046_s13 = smov %s807_s14 }
  0xe9   : > { %s1047_s14 = smov %s935_s18  ;;  %s1048_s15 = smov %s815_s16 }
  0xea   : > { %s1049_s16 = smov %s1051_s5  ;;  %23 = sbr.rel (!%p21_p13) target bundleno = 11 (0xb), region = 98 }
  0xef   :  { %401 = vsyncpa [#allocation3], 1 }
  0xf0   :  { %403 = vsyncpa [#allocation3 + $0x1], 1 }
  0xf1   :  { %404 = vsyncpa [#allocation6], 1 }
  0xf2   :  { %405 = vsyncpa [#allocation4], 1 }
  0xf3   :  { %407 = vsyncpa [#allocation4 + $0x1], 1 }
  0xf4   :  { %408 = vsyncpa [#allocation9], 1 }
  0xf5   :  { %410 = vsyncpa [#allocation9 + $0x1], 1 }

</bundles_post_ra>
